<compile_context>
chip_gen: v7x
topology: tpu7x:2x2x1
jax: 0.10.0
libtpu: 0.0.40
codegen_flags: <defaults>
</compile_context>

<pallas_src>
import functools

import jax
import jax.numpy as jnp
from jax import lax
from jax.experimental import pallas as pl
from jax.experimental.pallas import tpu as pltpu

TEMPERATURE = 0.5  # matches register_buffer('temperature', tensor(0.5))


def _round_up(x, mult):
    return ((x + mult - 1) // mult) * mult


def _normalize_f32(x):
    # F.normalize(x, dim=1): x / max(||x||_2, 1e-12), computed in f32.
    xf = x.astype(jnp.float32)
    nrm = jnp.maximum(jnp.sqrt(jnp.sum(xf * xf, axis=1, keepdims=True)), 1e-12)
    return xf / nrm


def _nt_xent_kernel(row_ref, colT_ref, out_ref, denom_lanes, num_lanes,
                    *, inv_t, n_valid, n_half):
    i = pl.program_id(0)
    j = pl.program_id(1)
    tr = row_ref.shape[0]
    tc = colT_ref.shape[1]

    @pl.when(j == 0)
    def _init():
        denom_lanes[...] = jnp.zeros_like(denom_lanes)
        num_lanes[...] = jnp.zeros_like(num_lanes)

    # (tr, tc) block of the cosine-similarity matrix on the MXU, f32 accumulate.
    # RHS is already (K, N) so no transpose is needed.
    sim = lax.dot_general(
        row_ref[...], colT_ref[...],
        (((1,), (0,)), ((), ())),
        preferred_element_type=jnp.float32,
    )
    # Shift by the max possible logit 1/T -> exp never overflows; shift cancels
    # exactly between numerator and denominator.
    # TODO(synk): for very small temperatures all off-diagonal terms can
    # underflow to 0; a per-row running max would be needed for full robustness.
    logits = sim * inv_t - inv_t

    row_g = i * tr + lax.broadcasted_iota(jnp.int32, (tr, tc), 0)
    col_g = j * tc + lax.broadcasted_iota(jnp.int32, (tr, tc), 1)
    partner = jnp.where(row_g < n_half, row_g + n_half, row_g - n_half)

    # Denominator: all valid (unpadded) columns except k == i, masked exactly.
    denom_term = jnp.where((col_g < n_valid) & (col_g != row_g),
                           jnp.exp(logits), 0.0)
    # Numerator logit: captured from the sim block itself (one hit per row).
    num_term = jnp.where(col_g == partner, logits, 0.0)

    # Fold to 128 lanes with VPU adds over static lane-aligned slabs; the
    # cross-lane XLU reduce is deferred to the finalize branch.
    d_acc = denom_lanes[...]
    n_acc = num_lanes[...]
    for b in range(tc // 128):
        sl = slice(b * 128, (b + 1) * 128)
        d_acc = d_acc + denom_term[:, sl]
        n_acc = n_acc + num_term[:, sl]
    denom_lanes[...] = d_acc
    num_lanes[...] = n_acc

    @pl.when(j == pl.num_programs(1) - 1)
    def _finalize():
        denom = jnp.sum(denom_lanes[...], axis=1, keepdims=True)
        num = jnp.sum(num_lanes[...], axis=1, keepdims=True)
        # -log(exp(num)/denom) = -num + log(denom)
        out_ref[...] = (-num + jnp.log(denom)).astype(out_ref.dtype)


def contrastive_loss(emb_i, emb_j, temperature=TEMPERATURE, mxu_dtype=None):
    """NT-Xent loss; `mxu_dtype=jnp.bfloat16` trades ~1e-3 logit error for MXU speed."""
    assert emb_i.shape == emb_j.shape and emb_i.ndim == 2
    n, d = emb_i.shape
    m = 2 * n

    # Normalize once in the wrapper (single fused pass), then one HBM concat.
    reps = jnp.concatenate([_normalize_f32(emb_i), _normalize_f32(emb_j)], axis=0)
    if mxu_dtype is not None:
        reps = reps.astype(mxu_dtype)

    # Pad rows to a multiple of 128 so tiles stay MXU/lane friendly for any N;
    # padded rows/cols are masked in-kernel and dropped from the final sum.
    m_pad = _round_up(m, 128)
    if m_pad != m:
        reps = jnp.pad(reps, ((0, m_pad - m), (0, 0)))
    reps_t = reps.T  # (d, m_pad): lane-dense column operand, MXU RHS already (K, N)

    # Column tile: 256 when possible (MXU-matched), else 128.
    tc = 256 if m_pad % 256 == 0 else 128
    # Row tile: larger to cut column-tile HBM re-reads, but keep >=2 row blocks
    # when possible so v7x megacore can split the "parallel" row axis.
    tr = next((t for t in (512, 256, 128) if m_pad % t == 0 and m_pad // t >= 2), 128)

    row_blocks = m_pad // tr
    col_blocks = m_pad // tc

    kernel = functools.partial(
        _nt_xent_kernel,
        inv_t=float(1.0 / temperature), n_valid=m, n_half=n)

    itemsize = reps.dtype.itemsize
    cost = pl.CostEstimate(
        flops=2 * m_pad * m_pad * d,
        transcendentals=m_pad * m_pad + m_pad,
        bytes_accessed=(row_blocks + 1) * m_pad * d * itemsize + m_pad * 4,
    )

    # Explicit VMEM budget (double-buffered input windows + scratch), v7x-safe cap.
    # TODO(synk): for very large D, add a contraction grid axis instead of one
    # (tr, D) / (D, tc) window per step.
    need = 2 * (tr * d + d * tc) * itemsize + 2 * tr * 4 + 2 * tr * 128 * 4
    vmem_limit = int(min(64 << 20, max(32 << 20, 2 * need)))

    per_row = pl.pallas_call(
        kernel,
        out_shape=jax.ShapeDtypeStruct((m_pad, 1), jnp.float32),
        grid_spec=pltpu.PrefetchScalarGridSpec(
            num_scalar_prefetch=0,
            grid=(row_blocks, col_blocks),
            in_specs=[
                pl.BlockSpec((tr, d), lambda i, j: (i, 0)),   # row tile (M, K)
                pl.BlockSpec((d, tc), lambda i, j: (0, j)),   # column tile (K, N)
            ],
            out_specs=pl.BlockSpec((tr, 1), lambda i, j: (i, 0)),
            scratch_shapes=[
                pltpu.VMEM((tr, 128), jnp.float32),   # lane-folded denominator
                pltpu.VMEM((tr, 128), jnp.float32),   # lane-folded numerator logit
            ],
        ),
        compiler_params=pltpu.CompilerParams(
            dimension_semantics=("parallel", "arbitrary"),
            vmem_limit_bytes=vmem_limit),
        cost_estimate=cost,
    )(reps, reps_t)

    # loss = (1 / 2N) * sum over all 2N ordered positive pairs (padded rows dropped).
    return jnp.sum(per_row[:m, 0]) / m


def _reference_loss(emb_i, emb_j, temperature=TEMPERATURE):
    # Pure-JAX reference mirroring the PyTorch forward, for verification.
    zi = emb_i / jnp.maximum(jnp.linalg.norm(emb_i, axis=1, keepdims=True), 1e-12)
    zj = emb_j / jnp.maximum(jnp.linalg.norm(emb_j, axis=1, keepdims=True), 1e-12)
    reps = jnp.concatenate([zi, zj], axis=0)
    sim = reps @ reps.T
    m = reps.shape[0]
    n = m // 2
    logits = sim / temperature
    exp_l = jnp.exp(logits)
    denom = jnp.sum(exp_l * (1.0 - jnp.eye(m)), axis=1)
    pair_idx = (jnp.arange(m) + n) % m
    num = jnp.exp(logits[jnp.arange(m), pair_idx])
    return jnp.mean(-jnp.log(num / denom))


if __name__ == "__main__":
    key = jax.random.PRNGKey(0)
    k1, k2 = jax.random.split(key)
    N, D = 8, 32  # batch of 8 embedding pairs, hidden dim 32
    emb_i = jax.random.normal(k1, (N, D), dtype=jnp.float32)
    emb_j = jax.random.normal(k2, (N, D), dtype=jnp.float32)

    loss = contrastive_loss(emb_i, emb_j)
    jax.block_until_ready(loss)

    ref = _reference_loss(emb_i, emb_j)
    assert jnp.allclose(loss, ref, atol=1e-4, rtol=1e-4), (loss, ref)

    print("KERNEL_OK")
</pallas_src>

<mosaic_0001>
module attributes {stable_mosaic.version = 11 : i64} {
  func.func @_nt_xent_kernel(%arg0: i32, %arg1: i32, %arg2: memref<128x32xf32, #tpu.memory_space<vmem>>, %arg3: memref<32x128xf32, #tpu.memory_space<vmem>>, %arg4: memref<128x1xf32, #tpu.memory_space<vmem>>, %arg5: memref<128x128xf32, #tpu.memory_space<vmem>>, %arg6: memref<128x128xf32, #tpu.memory_space<vmem>>) attributes {dimension_semantics = [#tpu.dimension_semantics<parallel>, #tpu.dimension_semantics<arbitrary>], iteration_bounds = array<i64: 1, 1>, scalar_prefetch = 0 : i64, scratch_operands = 2 : i64, tpu.core_type = #tpu.core_type<tc>, window_params = [{transform_indices = @transform_0, window_bounds = array<i64: 128, 32>}, {transform_indices = @transform_1, window_bounds = array<i64: 32, 128>}, {transform_indices = @transform_2, window_bounds = array<i64: 128, 1>}]} {
    %c0_i32 = arith.constant 0 : i32
    %0 = arith.cmpi eq, %arg1, %c0_i32 : i32
    %1 = arith.extui %0 : i1 to i32
    %c0_i32_0 = arith.constant 0 : i32
    %2 = arith.cmpi ne, %1, %c0_i32_0 : i32
    scf.if %2 {
      %cst_21 = arith.constant 0.000000e+00 : f32
      %44 = vector.broadcast %cst_21 : f32 to vector<128x128xf32>
      %c0_22 = arith.constant 0 : index
      %c0_23 = arith.constant 0 : index
      %45 = vector.load %arg5[%c0_22, %c0_23] : memref<128x128xf32, #tpu.memory_space<vmem>>, vector<128x128xf32>
      tpu.vector_store %arg5[%c0_22, %c0_23], %44 {strides = array<i32>} : memref<128x128xf32, #tpu.memory_space<vmem>>, vector<128x128xf32>,
      %cst_24 = arith.constant 0.000000e+00 : f32
      %46 = vector.broadcast %cst_24 : f32 to vector<128x128xf32>
      %c0_25 = arith.constant 0 : index
      %c0_26 = arith.constant 0 : index
      %47 = vector.load %arg6[%c0_25, %c0_26] : memref<128x128xf32, #tpu.memory_space<vmem>>, vector<128x128xf32>
      tpu.vector_store %arg6[%c0_25, %c0_26], %46 {strides = array<i32>} : memref<128x128xf32, #tpu.memory_space<vmem>>, vector<128x128xf32>,
    } else {
    }
    %c0 = arith.constant 0 : index
    %c0_1 = arith.constant 0 : index
    %3 = vector.load %arg2[%c0, %c0_1] : memref<128x32xf32, #tpu.memory_space<vmem>>, vector<128x32xf32>
    %c0_2 = arith.constant 0 : index
    %c0_3 = arith.constant 0 : index
    %4 = vector.load %arg3[%c0_2, %c0_3] : memref<32x128xf32, #tpu.memory_space<vmem>>, vector<32x128xf32>
    %cst = arith.constant dense<0.000000e+00> : vector<128x128xf32>
    %5 = tpu.matmul %3, %4, %cst {dimension_numbers = #tpu.dot_dimension_numbers<[1], [0], [0], [1], [0, 0, 1, 1], [], []>} : vector<128x32xf32>, vector<32x128xf32>, vector<128x128xf32> -> vector<128x128xf32>
    %cst_4 = arith.constant 2.000000e+00 : f32
    %6 = vector.broadcast %cst_4 : f32 to vector<128x128xf32>
    %7 = arith.mulf %5, %6 : vector<128x128xf32>
    %cst_5 = arith.constant 2.000000e+00 : f32
    %8 = vector.broadcast %cst_5 : f32 to vector<128x128xf32>
    %9 = arith.subf %7, %8 : vector<128x128xf32>
    %c128_i32 = arith.constant 128 : i32
    %10 = arith.muli %arg0, %c128_i32 : i32
    %11 = tpu.iota {dimensions = array<i32: 0>} : vector<128x128xi32>
    %12 = vector.broadcast %10 : i32 to vector<128x128xi32>
    %13 = arith.addi %12, %11 : vector<128x128xi32>
    %c128_i32_6 = arith.constant 128 : i32
    %14 = arith.muli %arg1, %c128_i32_6 : i32
    %15 = tpu.iota {dimensions = array<i32: 1>} : vector<128x128xi32>
    %16 = vector.broadcast %14 : i32 to vector<128x128xi32>
    %17 = arith.addi %16, %15 : vector<128x128xi32>
    %c8_i32 = arith.constant 8 : i32
    %18 = vector.broadcast %c8_i32 : i32 to vector<128x128xi32>
    %19 = arith.cmpi slt, %13, %18 : vector<128x128xi32>
    %c8_i32_7 = arith.constant 8 : i32
    %20 = vector.broadcast %c8_i32_7 : i32 to vector<128x128xi32>
    %21 = arith.addi %13, %20 : vector<128x128xi32>
    %c8_i32_8 = arith.constant 8 : i32
    %22 = vector.broadcast %c8_i32_8 : i32 to vector<128x128xi32>
    %23 = arith.subi %13, %22 : vector<128x128xi32>
    %24 = arith.select %19, %21, %23 : vector<128x128xi1>, vector<128x128xi32>
    %c16_i32 = arith.constant 16 : i32
    %25 = vector.broadcast %c16_i32 : i32 to vector<128x128xi32>
    %26 = arith.cmpi slt, %17, %25 : vector<128x128xi32>
    %27 = arith.cmpi ne, %17, %13 : vector<128x128xi32>
    %28 = arith.andi %26, %27 : vector<128x128xi1>
    %29 = math.exp %9 : vector<128x128xf32>
    %cst_9 = arith.constant 0.000000e+00 : f32
    %30 = vector.broadcast %cst_9 : f32 to vector<128x128xf32>
    %31 = arith.select %28, %29, %30 : vector<128x128xi1>, vector<128x128xf32>
    %32 = arith.cmpi eq, %17, %24 : vector<128x128xi32>
    %cst_10 = arith.constant 0.000000e+00 : f32
    %33 = vector.broadcast %cst_10 : f32 to vector<128x128xf32>
    %34 = arith.select %32, %9, %33 : vector<128x128xi1>, vector<128x128xf32>
    %c0_11 = arith.constant 0 : index
    %c0_12 = arith.constant 0 : index
    %35 = vector.load %arg5[%c0_11, %c0_12] : memref<128x128xf32, #tpu.memory_space<vmem>>, vector<128x128xf32>
    %c0_13 = arith.constant 0 : index
    %c0_14 = arith.constant 0 : index
    %36 = vector.load %arg6[%c0_13, %c0_14] : memref<128x128xf32, #tpu.memory_space<vmem>>, vector<128x128xf32>
    %37 = arith.addf %35, %31 : vector<128x128xf32>
    %38 = arith.addf %36, %34 : vector<128x128xf32>
    %c0_15 = arith.constant 0 : index
    %c0_16 = arith.constant 0 : index
    %39 = vector.load %arg5[%c0_15, %c0_16] : memref<128x128xf32, #tpu.memory_space<vmem>>, vector<128x128xf32>
    tpu.vector_store %arg5[%c0_15, %c0_16], %37 {strides = array<i32>} : memref<128x128xf32, #tpu.memory_space<vmem>>, vector<128x128xf32>,
    %c0_17 = arith.constant 0 : index
    %c0_18 = arith.constant 0 : index
    %40 = vector.load %arg6[%c0_17, %c0_18] : memref<128x128xf32, #tpu.memory_space<vmem>>, vector<128x128xf32>
    tpu.vector_store %arg6[%c0_17, %c0_18], %38 {strides = array<i32>} : memref<128x128xf32, #tpu.memory_space<vmem>>, vector<128x128xf32>,
    %c0_i32_19 = arith.constant 0 : i32
    %41 = arith.cmpi eq, %arg1, %c0_i32_19 : i32
    %42 = arith.extui %41 : i1 to i32
    %c0_i32_20 = arith.constant 0 : i32
    %43 = arith.cmpi ne, %42, %c0_i32_20 : i32
    scf.if %43 {
      %c0_21 = arith.constant 0 : index
      %c0_22 = arith.constant 0 : index
      %44 = vector.load %arg5[%c0_21, %c0_22] : memref<128x128xf32, #tpu.memory_space<vmem>>, vector<128x128xf32>
      %cst_23 = arith.constant dense<0.000000e+00> : vector<128xf32>
      %45 = vector.multi_reduction <add>, %44, %cst_23 [1] : vector<128x128xf32> to vector<128xf32>
      %46 = vector.shape_cast %45 : vector<128xf32> to vector<128x1xf32>
      %c0_24 = arith.constant 0 : index
      %c0_25 = arith.constant 0 : index
      %47 = vector.load %arg6[%c0_24, %c0_25] : memref<128x128xf32, #tpu.memory_space<vmem>>, vector<128x128xf32>
      %cst_26 = arith.constant dense<0.000000e+00> : vector<128xf32>
      %48 = vector.multi_reduction <add>, %47, %cst_26 [1] : vector<128x128xf32> to vector<128xf32>
      %49 = vector.shape_cast %48 : vector<128xf32> to vector<128x1xf32>
      %cst_27 = arith.constant 0.000000e+00 : f32
      %50 = vector.broadcast %cst_27 : f32 to vector<128x1xf32>
      %51 = arith.subf %50, %49 : vector<128x1xf32>
      %52 = math.log %46 : vector<128x1xf32>
      %53 = arith.addf %51, %52 : vector<128x1xf32>
      %c0_28 = arith.constant 0 : index
      %c0_29 = arith.constant 0 : index
      %54 = vector.load %arg4[%c0_28, %c0_29] : memref<128x1xf32, #tpu.memory_space<vmem>>, vector<128x1xf32>
      tpu.vector_store %arg4[%c0_28, %c0_29], %53 {strides = array<i32>} : memref<128x1xf32, #tpu.memory_space<vmem>>, vector<128x1xf32>,
    } else {
    }
    return
  }
  func.func @transform_0(%arg0: i32, %arg1: i32) -> (i32, i32) {
    %c0_i32 = arith.constant 0 : i32
    %c0_i32_0 = arith.constant 0 : i32
    return %arg0, %c0_i32 : i32, i32
  }
  func.func @transform_1(%arg0: i32, %arg1: i32) -> (i32, i32) {
    %c0_i32 = arith.constant 0 : i32
    %c0_i32_0 = arith.constant 0 : i32
    return %c0_i32, %arg1 : i32, i32
  }
  func.func @transform_2(%arg0: i32, %arg1: i32) -> (i32, i32) {
    %c0_i32 = arith.constant 0 : i32
    %c0_i32_0 = arith.constant 0 : i32
    return %arg0, %c0_i32 : i32, i32
  }
}

</mosaic_0001>

<bundles_post_ra>
// kernel: tpu_custom_call.1
= control target key start
LH: loop header
LB: loop body
LE: loop exit
PB: predicated region body
PF: predicated region fallthrough
CT: control target
= control target key end

     0   :  { %vm67_vm0 = vcmask 261120   ;;  %v294_v22 = vlaneseq  ;;  %s1328_s1 = inlined_call_operand.vmem [shape: f32[32,128], index: 1, kind: input, shape index: {}]   ;;  %s1329_s0 = inlined_call_operand.vmem [shape: f32[128,32], index: 0, kind: input, shape index: {}]   ;;  %s1330_s2 = inlined_call_operand.vmem [shape: f32[128,1], index: 2, kind: output, shape index: {}]  }
   0x1   :  { %v63_v0 = vld [vmem:[%s1328_s1] sm:$0xff]  ;;  %v64_v1 = vld [vmem:[%s1328_s1 + $0x8] sm:$0xff]  ;;  %v65_v2 = vld [vmem:[%s1328_s1 + $0x10] sm:$0xff] }
   0x2   :  { %v890_v3 = vpack.c.bf16 %v64_v1, %v63_v0  ;;  %v66_v4 = vld [vmem:[%s1328_s1 + $0x18] sm:$0xff]  ;;  %v47_v5 = vld [vmem:[%s1329_s0] sm:$0xff]  ;;  %v48_v8 = vld [vmem:[%s1329_s0 + $0x8] sm:$0xff]  ;;  %v1057_v23 = vshrl.u32 %v294_v22, 7  ;;  %v1068_v27 = vand.u32 127, %v294_v22 }
   0x3   :  { %v894_v6 = vpack.c.bf16 %v66_v4, %v65_v2  ;;  %866 = vmatprep.mubr.msk.f32.mxu0 %vm67_vm0, %v47_v5  ;;  %v55_v7 = vld [vmem:[%s1329_s0 + $0x40] sm:$0xff]  ;;  %v56_v9 = vld [vmem:[%s1329_s0 + $0x48] sm:$0xff]  ;;  %v49_v10 = vld [vmem:[%s1329_s0 + $0x10] sm:$0xff] }
   0x4   :  { %891 = vmatprep.subr.bf16.mxu0 %v890_v3  ;;  %898 = vmatprep.subr.bf16.mxu1 %v890_v3  ;;  %v57_v11 = vld [vmem:[%s1329_s0 + $0x50] sm:$0xff]  ;;  %v50_v12 = vld [vmem:[%s1329_s0 + $0x18] sm:$0xff]  ;;  %v51_v14 = vld [vmem:[%s1329_s0 + $0x20] sm:$0xff]  ;;  %v1060_v24 = vadd.s32 8, %v1057_v23  ;;  %v1063_v25 = vadd.s32 72, %v1057_v23  ;;  %v1066_v26 = vadd.s32 64, %v1057_v23 }
   0x5   :  { %893 = vmatpush3.bf16.msra.mxu0 %v890_v3  ;;  %900 = vmatpush3.bf16.msra.mxu1 %v890_v3  ;;  %v58_v13 = vld [vmem:[%s1329_s0 + $0x58] sm:$0xff]  ;;  %v59_v15 = vld [vmem:[%s1329_s0 + $0x60] sm:$0xff]  ;;  %v52_v16 = vld [vmem:[%s1329_s0 + $0x28] sm:$0xff]  ;;  %v1072_v29 = vadd.s32 24, %v1057_v23  ;;  %v1077_v34 = vadd.s32 16, %v1057_v23  ;;  %v1082_v42 = vadd.s32 40, %v1057_v23 }
   0x6   :  { %895 = vmatprep.subr.bf16.mxu0 %v894_v6  ;;  %899 = vmatprep.subr.bf16.mxu1 %v894_v6  ;;  %v60_v17 = vld [vmem:[%s1329_s0 + $0x68] sm:$0xff]  ;;  %v53_v18 = vld [vmem:[%s1329_s0 + $0x30] sm:$0xff]  ;;  %v54_v20 = vld [vmem:[%s1329_s0 + $0x38] sm:$0xff]  ;;  %v823_v28 = vadd.s32 4294967288, %v1060_v24  ;;  %v831_v30 = vadd.s32 4294967288, %v1063_v25  ;;  %v830_v33 = vadd.s32 4294967288, %v1066_v26  ;;  %vm478_vm2 = vcmp.eq.s32.totalorder %v1068_v27, %v1060_v24 }
   0x7   :  { %878 = vmatprep.mubr.msk.f32.mxu1 %vm67_vm0, %v55_v7  ;;  %v61_v19 = vld [vmem:[%s1329_s0 + $0x70] sm:$0xff]  ;;  %v62_v21 = vld [vmem:[%s1329_s0 + $0x78] sm:$0xff]  ;;  %v825_v41 = vadd.s32 4294967288, %v1072_v29  ;;  %v824_v49 = vadd.s32 4294967288, %v1077_v34  ;;  %v1094_v53 = vadd.s32 32, %v1057_v23  ;;  %v827_v56 = vadd.s32 4294967288, %v1082_v42 }
   0x8   :  { %vm479_vm1 = vcmp.eq.s32.totalorder %v1068_v27, %v823_v28  ;;  %vm487_vm3 = vcmp.eq.s32.totalorder %v1068_v27, %v831_v30  ;;  %vm486_vm4 = vcmp.eq.s32.totalorder %v1068_v27, %v830_v33  ;;  %v1101_v61 = vadd.s32 56, %v1057_v23 }
   0x9   :  { %897 = vmatpush3.bf16.msra.mxu0 %v894_v6  ;;  %901 = vmatpush3.bf16.msra.mxu1 %v894_v6  ;;  %vm481_vm5 = vcmp.eq.s32.totalorder %v1068_v27, %v825_v41  ;;  %vm480_vm6 = vcmp.eq.s32.totalorder %v1068_v27, %v824_v49  ;;  %v826_v6 = vadd.s32 4294967288, %v1094_v53  ;;  %vm483_vm7 = vcmp.eq.s32.totalorder %v1068_v27, %v827_v56 }
   0xa   :  { %vm397_vm9 = vcmp.lt.s32.totalorder %v1068_v27, 16  ;;  %vm399_vm11 = vcmp.ne.s32.totalorder %v1068_v27, %v1060_v24  ;;  %vm407_vm13 = vcmp.ne.s32.totalorder %v1068_v27, %v1063_v25  ;;  %v1149_v25 = vadd.s32 88, %v1057_v23 }
   0xb   :  { %vm482_vm8 = vcmp.eq.s32.totalorder %v1068_v27, %v826_v6  ;;  %vm415_vm12 = vmand %vm397_vm9, %vm399_vm11 }
   0xc   :  { %867 = vmatmul.mubr.msk.f32.vlgmr.msra.gmra.mrb[0].mxu0 %vm67_vm0, %v48_v8  ;;  %879 = vmatmul.mubr.msk.f32.vlgmr.msra.gmra.mrb[0].mxu1 %vm67_vm0, %v56_v9  ;;  %vm423_vm14 = vmand %vm397_vm9, %vm407_vm13  ;;  %vm403_vm13 = vcmp.ne.s32.totalorder %v1068_v27, %v1082_v42 }
   0xd   :  { %869 = vmatprep.mubr.msk.f32.mxu0 %vm67_vm0, %v49_v10  ;;  %881 = vmatprep.mubr.msk.f32.mxu1 %vm67_vm0, %v57_v11 }
  0x10   :  { %870 = vmatmul.mubr.msk.f32.gmra.mrb[2].mxu0 %vm67_vm0, %v50_v12  ;;  %882 = vmatmul.mubr.msk.f32.gmra.mrb[2].mxu1 %vm67_vm0, %v58_v13  ;;  %v829_v12 = vadd.s32 4294967288, %v1101_v61 }
  0x11   :  { %872 = vmatprep.mubr.msk.f32.mxu0 %vm67_vm0, %v51_v14  ;;  %884 = vmatprep.mubr.msk.f32.mxu1 %vm67_vm0, %v59_v15 }
  0x12   :  { %vm485_vm10 = vcmp.eq.s32.totalorder %v1068_v27, %v829_v12 }
  0x14   :  { %873 = vmatmul.mubr.msk.f32.gmra.mrb[4].mxu0 %vm67_vm0, %v52_v16  ;;  %885 = vmatmul.mubr.msk.f32.gmra.mrb[4].mxu1 %vm67_vm0, %v60_v17 }
  0x15   :  { %875 = vmatprep.mubr.msk.f32.mxu0 %vm67_vm0, %v53_v18  ;;  %887 = vmatprep.mubr.msk.f32.mxu1 %vm67_vm0, %v61_v19 }
  0x18   :  { %876 = vmatmul.mubr.msk.f32.gmra.mrb[6].mxu0 %vm67_vm0, %v54_v20  ;;  %888 = vmatmul.mubr.msk.f32.gmra.mrb[6].mxu1 %vm67_vm0, %v62_v21  ;;  %vm401_vm0 = vcmp.ne.s32.totalorder %v1068_v27, %v1072_v29 }
  0xdf   :  { %v868_v31 = vpop.f32.mrb[0].mxu0  ;;  %v880_v32 = vpop.f32.mrb[0].mxu1 }
  0xe0   :  { %v262_v35 = vmul.f32 2.0, %v868_v31  ;;  %v182_v36 = vpop.f32.mrb[1].mxu0  ;;  %v270_v37 = vmul.f32 2.0, %v880_v32  ;;  %v222_v38 = vpop.f32.mrb[1].mxu1  ;;  %v1124_v32 = vadd.s32 48, %v1057_v23 }
  0xe1   :  { %v261_v39 = vmul.f32 2.0, %v182_v36  ;;  %v269_v40 = vmul.f32 2.0, %v222_v38 }
  0xe2   :  { %v807_v43 = vadd.f32 -2.0, %v262_v35  ;;  %v815_v44 = vadd.f32 -2.0, %v270_v37  ;;  %v828_v41 = vadd.s32 4294967288, %v1124_v32 }
  0xe3   :  { %v806_v45 = vadd.f32 -2.0, %v261_v39  ;;  %v1087_v46 = vadd.f32 -2.0, %v269_v40  ;;  %v871_v47 = vpop.f32.mrb[2].mxu0  ;;  %v883_v48 = vpop.f32.mrb[2].mxu1 }
  0xe4   :  { %v432_v50 = vmul.f32 1.442695, %v807_v43  ;;  %v495_v51 = vsel %vm479_vm1, %v807_v43, 0.0  ;;  %v264_v52 = vmul.f32 2.0, %v871_v47  ;;  %v192_v55 = vpop.f32.mrb[3].mxu0  ;;  %v503_v59 = vsel %vm487_vm3, %v815_v44, 0.0  ;;  %vm417_vm3 = vmand %vm397_vm9, %vm401_vm0 }
  0xe5   :  { %675 = vadd.xlane.f32.xlu1 %v495_v51  ;;  %v494_v54 = vsel %vm478_vm2, %v806_v45, 0.0  ;;  %v263_v58 = vmul.f32 2.0, %v192_v55  ;;  %v232_v60 = vpop.f32.mrb[3].mxu1  ;;  %v448_v62 = vmul.f32 1.442695, %v815_v44  ;;  %v502_v63 = vsel %vm486_vm4, %v1087_v46, 0.0  ;;  %vm419_vm0 = vmand %vm397_vm9, %vm403_vm13 }
  0xe6   :  { %673 = vadd.xlane.f32.xlu0 %v494_v54  ;;  %v809_v57 = vadd.f32 -2.0, %v264_v52  ;;  %v272_v1 = vmul.f32 2.0, %v883_v48  ;;  %902 = vpow2.f32 %v432_v50  ;;  %v430_v17 = vmul.f32 1.442695, %v806_v45 }
  0xe7   :  { %v874_v0 = vpop.f32.mrb[4].mxu0  ;;  %v886_v2 = vpop.f32.mrb[4].mxu1  ;;  %v808_v3 = vadd.f32 -2.0, %v263_v58  ;;  %904 = vpow2.f32 %v448_v62  ;;  %v271_v19 = vmul.f32 2.0, %v232_v60  ;;  %v446_v35 = vmul.f32 1.442695, %v1087_v46 }
  0xe8   :  { %v266_v4 = vmul.f32 2.0, %v874_v0  ;;  %v202_v5 = vpop.f32.mrb[5].mxu0  ;;  %v242_v7 = vpop.f32.mrb[5].mxu1  ;;  %v1108_v9 = vadd.f32 -2.0, %v272_v1  ;;  %v497_v11 = vsel %vm481_vm5, %v809_v57, 0.0  ;;  %v274_v38 = vmul.f32 2.0, %v886_v2 }
  0xe9   :  { %691 = vadd.xlane.f32.xlu1 %v503_v59  ;;  %v265_v8 = vmul.f32 2.0, %v202_v5  ;;  %v436_v13 = vmul.f32 1.442695, %v809_v57  ;;  %v496_v15 = vsel %vm480_vm6, %v808_v3, 0.0  ;;  %v1130_v36 = vadd.f32 -2.0, %v271_v19 }
  0xea   :  { %689 = vadd.xlane.f32.xlu0 %v502_v63  ;;  %v811_v10 = vadd.f32 -2.0, %v266_v4  ;;  %v452_v22 = vmul.f32 1.442695, %v1108_v9  ;;  %v273_v24 = vmul.f32 2.0, %v242_v7  ;;  %v434_v43 = vmul.f32 1.442695, %v808_v3 }
  0xeb   :  { %v810_v14 = vadd.f32 -2.0, %v265_v8  ;;  %v877_v16 = vpop.f32.mrb[6].mxu0  ;;  %v889_v21 = vpop.f32.mrb[6].mxu1  ;;  %906 = vpow2.f32 %v436_v13  ;;  %v450_v44 = vmul.f32 1.442695, %v1130_v36  ;;  %v1139_v48 = vadd.f32 -2.0, %v274_v38 }
  0xec   :  { %v268_v18 = vmul.f32 2.0, %v877_v16  ;;  %v212_v20 = vpop.f32.mrb[7].mxu0  ;;  %v252_v28 = vpop.f32.mrb[7].mxu1  ;;  %v499_v31 = vsel %vm483_vm7, %v811_v10, 0.0  ;;  %908 = vpow2.f32 %v430_v17  ;;  %v1143_v49 = vadd.f32 -2.0, %v273_v24 }
  0xed   :  { %679 = vadd.xlane.f32.xlu1 %v497_v11  ;;  %v498_v33 = vsel %vm482_vm8, %v810_v14, 0.0  ;;  %910 = vpow2.f32 %v452_v22  ;;  %v267_v37 = vmul.f32 2.0, %v212_v20  ;;  %vm484_vm15 = vcmp.eq.s32.totalorder %v1068_v27, %v828_v41 }
  0xee   :  { %677 = vadd.xlane.f32.xlu0 %v496_v15  ;;  %v1118_v30 = vadd.f32 -2.0, %v268_v18  ;;  %912 = vpow2.f32 %v446_v35  ;;  %v440_v50 = vmul.f32 1.442695, %v811_v10  ;;  %vm398_vm1 = vcmp.ne.s32.totalorder %v1068_v27, %v1057_v23 }
  0xef   :  { %v812_v46 = vadd.f32 -2.0, %v267_v37  ;;  %914 = vpow2.f32 %v434_v43  ;;  %v438_v51 = vmul.f32 1.442695, %v810_v14  ;;  %vm409_vm2 = vcmp.ne.s32.totalorder %v1068_v27, %v1149_v25  ;;  %vm414_vm4 = vmand %vm397_vm9, %vm398_vm1 }
  0xf0   :  { %v903_v39 = vpop.eup %902  ;;  %v501_v40 = vsel %vm485_vm10, %v1118_v30, 0.0  ;;  %916 = vpow2.f32 %v450_v44  ;;  %v456_v55 = vmul.f32 1.442695, %v1139_v48  ;;  %v276_v29 = vmul.f32 2.0, %v889_v21  ;;  %vm1163_vm5 = vmand %vm397_vm9, %vm409_vm2 }
  0xf1   :  { %683 = vadd.xlane.f32.xlu1 %v499_v31  ;;  %v905_v45 = vpop.eup %904  ;;  %v463_v47 = vsel %vm415_vm12, %v903_v39, 0.0  ;;  %v500_v56 = vsel %vm484_vm15, %v812_v46, 0.0  ;;  %v454_v58 = vmul.f32 1.442695, %v1143_v49  ;;  %v275_v59 = vmul.f32 2.0, %v252_v28 }
  0xf2   :  { %681 = vadd.xlane.f32.xlu0 %v498_v33  ;;  %v471_v52 = vsel %vm423_vm14, %v905_v45, 0.0  ;;  %918 = vpow2.f32 %v440_v50  ;;  %vm406_vm6 = vcmp.ne.s32.totalorder %v1068_v27, %v1066_v26  ;;  %v1169_v1 = vadd.f32 -2.0, %v276_v29 }
  0xf3   :  { %920 = vpow2.f32 %v438_v51  ;;  %v1172_v2 = vadd.s32 80, %v1057_v23  ;;  %v1176_v5 = vadd.f32 -2.0, %v275_v59  ;;  %vm422_vm7 = vmand %vm397_vm9, %vm406_vm6  ;;  %vm400_vm8 = vcmp.ne.s32.totalorder %v1068_v27, %v1077_v34 }
  0xf4   :  { %922 = vpow2.f32 %v456_v55  ;;  %v444_v26 = vmul.f32 1.442695, %v1118_v30  ;;  %v442_v6 = vmul.f32 1.442695, %v812_v46  ;;  %v460_v8 = vmul.f32 1.442695, %v1169_v1  ;;  %vm416_vm11 = vmand %vm397_vm9, %vm400_vm8 }
  0xf5   :  { %687 = vadd.xlane.f32.xlu1 %v501_v40  ;;  %v907_v54 = vpop.eup %906  ;;  %924 = vpow2.f32 %v454_v58  ;;  %vm408_vm10 = vcmp.ne.s32.totalorder %v1068_v27, %v1172_v2  ;;  %v458_v12 = vmul.f32 1.442695, %v1176_v5  ;;  %v308_v13 = vadd.s32 104, %v1057_v23 }
  0xf6   :  { %627 = vadd.xlane.f32.xlu0 %v463_v47  ;;  %v909_v57 = vpop.eup %908  ;;  %v465_v63 = vsel %vm417_vm3, %v907_v54, 0.0  ;;  %vm1191_vm12 = vmand %vm397_vm9, %vm408_vm10  ;;  %926 = vpow2.f32 %v444_v26  ;;  %vm402_vm14 = vcmp.ne.s32.totalorder %v1068_v27, %v1094_v53  ;;  %v307_v14 = vadd.s32 96, %v1057_v23 }
  0xf7   :  { %v911_v60 = vpop.eup %910  ;;  %v462_v0 = vsel %vm414_vm4, %v909_v57, 0.0  ;;  %928 = vpow2.f32 %v442_v6  ;;  %vm411_vm15 = vcmp.ne.s32.totalorder %v1068_v27, %v308_v13  ;;  %vm418_vm2 = vmand %vm397_vm9, %vm402_vm14  ;;  %v310_v28 = vadd.s32 120, %v1057_v23 }
  0xf8   :  { %v913_v3 = vpop.eup %912  ;;  %v473_v4 = vsel %vm1163_vm5, %v911_v60, 0.0  ;;  %930 = vpow2.f32 %v460_v8  ;;  %vm410_vm1 = vcmp.ne.s32.totalorder %v1068_v27, %v307_v14  ;;  %vm427_vm3 = vmand %vm397_vm9, %vm411_vm15  ;;  %vm405_vm5 = vcmp.ne.s32.totalorder %v1068_v27, %v1101_v61 }
  0xf9   :  { %643 = vadd.xlane.f32.xlu1 %v471_v52  ;;  %v915_v7 = vpop.eup %914  ;;  %v470_v10 = vsel %vm422_vm7, %v913_v3, 0.0  ;;  %932 = vpow2.f32 %v458_v12  ;;  %vm1213_vm4 = vmand %vm397_vm9, %vm410_vm1  ;;  %vm404_vm6 = vcmp.ne.s32.totalorder %v1068_v27, %v1124_v32  ;;  %v309_v31 = vadd.s32 112, %v1057_v23 }
  0xfa   :  { %685 = vadd.xlane.f32.xlu0 %v500_v56  ;;  %v917_v11 = vpop.eup %916  ;;  %v464_v15 = vsel %vm416_vm11, %v915_v7, 0.0  ;;  %vm413_vm7 = vcmp.ne.s32.totalorder %v1068_v27, %v310_v28  ;;  %vm421_vm8 = vmand %vm397_vm9, %vm405_vm5  ;;  %v833_v38 = vadd.s32 4294967288, %v1149_v25  ;;  %v832_v40 = vadd.s32 4294967288, %v1172_v2 }
  0xfb   :  { %v472_v17 = vsel %vm1191_vm12, %v917_v11, 0.0  ;;  %vm412_vm10 = vcmp.ne.s32.totalorder %v1068_v27, %v309_v31  ;;  %vm420_vm11 = vmand %vm397_vm9, %vm404_vm6  ;;  %v835_v41 = vadd.s32 4294967288, %v308_v13  ;;  %v834_v43 = vadd.s32 4294967288, %v307_v14 }
  0xfc   :  { %v919_v16 = vpop.eup %918  ;;  %vm429_vm12 = vmand %vm397_vm9, %vm413_vm7  ;;  %vm489_vm14 = vcmp.eq.s32.totalorder %v1068_v27, %v833_v38  ;;  %vm488_vm15 = vcmp.eq.s32.totalorder %v1068_v27, %v832_v40  ;;  %v837_v46 = vadd.s32 4294967288, %v310_v28  ;;  %v836_v47 = vadd.s32 4294967288, %v309_v31 }
  0xfd   :  { %631 = vadd.xlane.f32.xlu1 %v465_v63  ;;  %v921_v42 = vpop.eup %920  ;;  %v467_v19 = vsel %vm419_vm0, %v919_v16, 0.0  ;;  %vm428_vm13 = vmand %vm397_vm9, %vm412_vm10  ;;  %v505_v44 = vsel %vm489_vm14, %v1108_v9, 0.0  ;;  %v504_v45 = vsel %vm488_vm15, %v1130_v36, 0.0  ;;  %vm491_vm9 = vcmp.eq.s32.totalorder %v1068_v27, %v835_v41 }
  0xfe   :  { %625 = vadd.xlane.f32.xlu0 %v462_v0  ;;  %v923_v53 = vpop.eup %922  ;;  %v466_v21 = vsel %vm418_vm2, %v921_v42, 0.0  ;;  %vm490_vm0 = vcmp.eq.s32.totalorder %v1068_v27, %v834_v43  ;;  %v507_v25 = vsel %vm491_vm9, %v1139_v48, 0.0  ;;  %vm493_vm1 = vcmp.eq.s32.totalorder %v1068_v27, %v837_v46 }
  0xff   :  { %v925_v18 = vpop.eup %924  ;;  %v475_v22 = vsel %vm427_vm3, %v923_v53, 0.0  ;;  %v506_v50 = vsel %vm490_vm0, %v1143_v49, 0.0  ;;  %vm492_vm2 = vcmp.eq.s32.totalorder %v1068_v27, %v836_v47  ;;  %v509_v9 = vsel %vm493_vm1, %v1169_v1, 0.0 }
 0x100   :  { %v474_v30 = vsel %vm1213_vm4, %v925_v18, 0.0  ;;  %v927_v33 = vpop.eup %926  ;;  %v508_v36 = vsel %vm492_vm2, %v1176_v5, 0.0  ;;  %vm769_vm3 = vcmask 7168  }
 0x101   :  { %647 = vadd.xlane.f32.xlu1 %v473_v4  ;;  %v929_v61 = vpop.eup %928  ;;  %v469_v23 = vsel %vm421_vm8, %v927_v33, 0.0 }
 0x102   :  { %641 = vadd.xlane.f32.xlu0 %v470_v10  ;;  %v931_v35 = vpop.eup %930  ;;  %v468_v37 = vsel %vm420_vm11, %v929_v61, 0.0 }
 0x103   :  { %v933_v32 = vpop.eup %932  ;;  %v477_v39 = vsel %vm429_vm12, %v931_v35, 0.0 }
 0x104   :  { %v476_v24 = vsel %vm428_vm13, %v933_v32, 0.0 }
 0x105   :  { %629 = vadd.xlane.f32.xlu1 %v464_v15 }
 0x106   :  { %645 = vadd.xlane.f32.xlu0 %v472_v17 }
 0x109   :  { %635 = vadd.xlane.f32.xlu1 %v467_v19 }
 0x10a   :  { %633 = vadd.xlane.f32.xlu0 %v466_v21 }
 0x10d   :  { %651 = vadd.xlane.f32.xlu1 %v475_v22 }
 0x10e   :  { %649 = vadd.xlane.f32.xlu0 %v474_v30 }
 0x111   :  { %639 = vadd.xlane.f32.xlu1 %v469_v23 }
 0x112   :  { %637 = vadd.xlane.f32.xlu0 %v468_v37 }
 0x115   :  { %655 = vadd.xlane.f32.xlu1 %v477_v39 }
 0x116   :  { %653 = vadd.xlane.f32.xlu0 %v476_v24 }
 0x119   :  { %695 = vadd.xlane.f32.xlu1 %v505_v44 }
 0x11a   :  { %693 = vadd.xlane.f32.xlu0 %v504_v45 }
 0x11d   :  { %699 = vadd.xlane.f32.xlu1 %v507_v25 }
 0x11e   :  { %697 = vadd.xlane.f32.xlu0 %v506_v50 }
 0x121   :  { %703 = vadd.xlane.f32.xlu1 %v509_v9 }
 0x122   :  { %701 = vadd.xlane.f32.xlu0 %v508_v36 }
 0x172   :  { %v676_v51 = vpop.xlane.xlu1 %675 }
 0x173   :  { %v674_v52 = vpop.xlane.xlu0 %673  ;;  %v706_v1 = vsub.f32 0.0, %v676_v51 }
 0x174   :  { %v705_v15 = vsub.f32 0.0, %v674_v52 }
 0x176   :  { %v692_v54 = vpop.xlane.xlu1 %691 }
 0x177   :  { %v690_v55 = vpop.xlane.xlu0 %689  ;;  %v714_v26 = vsub.f32 0.0, %v692_v54 }
 0x178   :  { %v713_v20 = vsub.f32 0.0, %v690_v55 }
 0x17a   :  { %v680_v56 = vpop.xlane.xlu1 %679 }
 0x17b   :  { %v1249_v48 = vpop.xlane.xlu0 %677  ;;  %v708_v34 = vsub.f32 0.0, %v680_v56 }
 0x17c   :  { %v707_v31 = vsub.f32 0.0, %v1249_v48 }
 0x17e   :  { %v1251_v29 = vpop.xlane.xlu1 %683 }
 0x17f   :  { %v1253_v49 = vpop.xlane.xlu0 %681  ;;  %v710_v38 = vsub.f32 0.0, %v1251_v29 }
 0x180   :  { %v709_v24 = vsub.f32 0.0, %v1253_v49 }
 0x182   :  { %v1255_v57 = vpop.xlane.xlu1 %687 }
 0x183   :  { %v628_v27 = vpop.xlane.xlu0 %627  ;;  %v712_v49 = vsub.f32 0.0, %v1255_v57 }
 0x184   :  { %934 = vlog2.f32 %v628_v27 }
 0x186   :  { %v644_v58 = vpop.xlane.xlu1 %643 }
 0x187   :  { %936 = vlog2.f32 %v644_v58  ;;  %v1257_v59 = vpop.xlane.xlu0 %685 }
 0x18a   :  { %v632_v60 = vpop.xlane.xlu1 %631 }
 0x18b   :  { %938 = vlog2.f32 %v632_v60  ;;  %v626_v62 = vpop.xlane.xlu0 %625 }
 0x18c   :  { %940 = vlog2.f32 %v626_v62  ;;  %v711_v62 = vsub.f32 0.0, %v1257_v59 }
 0x18e   :  { %v935_v63 = vpop.eup %934  ;;  %v648_v0 = vpop.xlane.xlu1 %647 }
 0x18f   :  { %v724_v2 = vmul.f32 0.6931472, %v935_v63  ;;  %v642_v3 = vpop.xlane.xlu0 %641 }
 0x190   :  { %942 = vlog2.f32 %v642_v3 }
 0x191   :  { %v937_v4 = vpop.eup %936  ;;  %v754_v5 = vadd.f32 %v724_v2, %v706_v1 }
 0x192   :  { %v740_v6 = vmul.f32 0.6931472, %v937_v4  ;;  %v630_v7 = vpop.xlane.xlu1 %629 }
 0x193   :  { %771 = vst.msk [vmem:[%s1330_s2 + $0x8] sm:$0xff] %vm769_vm3, %v754_v5  ;;  %944 = vlog2.f32 %v630_v7  ;;  %v646_v8 = vpop.xlane.xlu0 %645 }
 0x194   :  { %v762_v10 = vadd.f32 %v740_v6, %v714_v26 }
 0x195   :  { %v939_v11 = vpop.eup %938 }
 0x196   :  { %v941_v12 = vpop.eup %940  ;;  %779 = vst.msk [vmem:[%s1330_s2 + $0x48] sm:$0xff] %vm769_vm3, %v762_v10  ;;  %v728_v13 = vmul.f32 0.6931472, %v939_v11  ;;  %v636_v14 = vpop.xlane.xlu1 %635 }
 0x197   :  { %v722_v16 = vmul.f32 0.6931472, %v941_v12  ;;  %946 = vlog2.f32 %v636_v14  ;;  %v634_v17 = vpop.xlane.xlu0 %633 }
 0x198   :  { %v756_v42 = vadd.f32 %v728_v13, %v708_v34  ;;  %948 = vlog2.f32 %v634_v17 }
 0x199   :  { %v753_v53 = vadd.f32 %v722_v16, %v705_v15  ;;  %950 = vlog2.f32 %v648_v0 }
 0x19a   :  { %v943_v18 = vpop.eup %942  ;;  %773 = vst.msk [vmem:[%s1330_s2 + $0x18] sm:$0xff] %vm769_vm3, %v756_v42  ;;  %v652_v19 = vpop.xlane.xlu1 %651  ;;  %952 = vlog2.f32 %v646_v8 }
 0x19b   :  { %770 = vst.msk [vmem:[%s1330_s2] sm:$0xff] %vm769_vm3, %v753_v53  ;;  %v738_v21 = vmul.f32 0.6931472, %v943_v18  ;;  %v650_v22 = vpop.xlane.xlu0 %649  ;;  %954 = vlog2.f32 %v652_v19 }
 0x19c   :  { %956 = vlog2.f32 %v650_v22 }
 0x19d   :  { %v945_v28 = vpop.eup %944  ;;  %v761_v30 = vadd.f32 %v738_v21, %v713_v20 }
 0x19e   :  { %v726_v33 = vmul.f32 0.6931472, %v945_v28  ;;  %v640_v61 = vpop.xlane.xlu1 %639 }
 0x19f   :  { %778 = vst.msk [vmem:[%s1330_s2 + $0x40] sm:$0xff] %vm769_vm3, %v761_v30  ;;  %958 = vlog2.f32 %v640_v61  ;;  %v638_v35 = vpop.xlane.xlu0 %637 }
 0x1a0   :  { %v755_v32 = vadd.f32 %v726_v33, %v707_v31  ;;  %960 = vlog2.f32 %v638_v35 }
 0x1a1   :  { %v947_v23 = vpop.eup %946 }
 0x1a2   :  { %v949_v37 = vpop.eup %948  ;;  %772 = vst.msk [vmem:[%s1330_s2 + $0x10] sm:$0xff] %vm769_vm3, %v755_v32  ;;  %v732_v39 = vmul.f32 0.6931472, %v947_v23  ;;  %v656_v40 = vpop.xlane.xlu1 %655 }
 0x1a3   :  { %v730_v41 = vmul.f32 0.6931472, %v949_v37  ;;  %962 = vlog2.f32 %v656_v40  ;;  %v654_v43 = vpop.xlane.xlu0 %653  ;;  %v951_v44 = vpop.eup %950 }
 0x1a4   :  { %v758_v45 = vadd.f32 %v732_v39, %v710_v38  ;;  %964 = vlog2.f32 %v654_v43  ;;  %v953_v46 = vpop.eup %952  ;;  %v744_v9 = vmul.f32 0.6931472, %v951_v44 }
 0x1a5   :  { %v757_v47 = vadd.f32 %v730_v41, %v709_v24  ;;  %v955_v50 = vpop.eup %954  ;;  %v742_v54 = vmul.f32 0.6931472, %v953_v46 }
 0x1a6   :  { %775 = vst.msk [vmem:[%s1330_s2 + $0x28] sm:$0xff] %vm769_vm3, %v758_v45  ;;  %v696_v25 = vpop.xlane.xlu1 %695  ;;  %v957_v52 = vpop.eup %956  ;;  %v748_v63 = vmul.f32 0.6931472, %v955_v50 }
 0x1a7   :  { %774 = vst.msk [vmem:[%s1330_s2 + $0x20] sm:$0xff] %vm769_vm3, %v757_v47  ;;  %v716_v36 = vsub.f32 0.0, %v696_v25  ;;  %v694_v51 = vpop.xlane.xlu0 %693  ;;  %v746_v3 = vmul.f32 0.6931472, %v957_v52 }
 0x1a8   :  { %v715_v55 = vsub.f32 0.0, %v694_v51 }
 0x1a9   :  { %v959_v56 = vpop.eup %958  ;;  %v764_v48 = vadd.f32 %v744_v9, %v716_v36 }
 0x1aa   :  { %v961_v29 = vpop.eup %960  ;;  %v736_v27 = vmul.f32 0.6931472, %v959_v56  ;;  %v763_v58 = vadd.f32 %v742_v54, %v715_v55  ;;  %v700_v60 = vpop.xlane.xlu1 %699 }
 0x1ab   :  { %v734_v0 = vmul.f32 0.6931472, %v961_v29  ;;  %781 = vst.msk [vmem:[%s1330_s2 + $0x58] sm:$0xff] %vm769_vm3, %v764_v48  ;;  %v718_v1 = vsub.f32 0.0, %v700_v60  ;;  %v698_v2 = vpop.xlane.xlu0 %697 }
 0x1ac   :  { %v760_v4 = vadd.f32 %v736_v27, %v712_v49  ;;  %780 = vst.msk [vmem:[%s1330_s2 + $0x50] sm:$0xff] %vm769_vm3, %v763_v58  ;;  %v717_v57 = vsub.f32 0.0, %v698_v2 }
 0x1ad   :  { %v963_v5 = vpop.eup %962  ;;  %v759_v26 = vadd.f32 %v734_v0, %v711_v62  ;;  %v766_v59 = vadd.f32 %v748_v63, %v718_v1 }
 0x1ae   :  { %v965_v6 = vpop.eup %964  ;;  %777 = vst.msk [vmem:[%s1330_s2 + $0x38] sm:$0xff] %vm769_vm3, %v760_v4  ;;  %v752_v7 = vmul.f32 0.6931472, %v963_v5  ;;  %v765_v8 = vadd.f32 %v746_v3, %v717_v57  ;;  %v704_v10 = vpop.xlane.xlu1 %703 }
 0x1af   :  { %776 = vst.msk [vmem:[%s1330_s2 + $0x30] sm:$0xff] %vm769_vm3, %v759_v26  ;;  %v750_v11 = vmul.f32 0.6931472, %v965_v6  ;;  %783 = vst.msk [vmem:[%s1330_s2 + $0x68] sm:$0xff] %vm769_vm3, %v766_v59  ;;  %v720_v12 = vsub.f32 0.0, %v704_v10  ;;  %v702_v34 = vpop.xlane.xlu0 %701 }
 0x1b0   :  { %782 = vst.msk [vmem:[%s1330_s2 + $0x60] sm:$0xff] %vm769_vm3, %v765_v8  ;;  %v719_v13 = vsub.f32 0.0, %v702_v34 }
 0x1b1   :  { %v768_v14 = vadd.f32 %v752_v7, %v720_v12 }
 0x1b2   :  { %v767_v15 = vadd.f32 %v750_v11, %v719_v13 }
 0x1b3   :  { %785 = vst.msk [vmem:[%s1330_s2 + $0x78] sm:$0xff] %vm769_vm3, %v768_v14 }
 0x1b4   :  { %784 = vst.msk [vmem:[%s1330_s2 + $0x70] sm:$0xff] %vm769_vm3, %v767_v15 }

</bundles_post_ra>
